<compile_context>
chip_gen: v7x
topology: tpu7x:2x2x1
jax: 0.10.0
libtpu: 0.0.40
codegen_flags: <defaults>
</compile_context>

<pallas_src>
import numpy as np
import jax
import jax.numpy as jnp
from jax.experimental import pallas as pl
from jax.experimental.pallas import tpu as pltpu


# Flipped Haar synthesis filters of the PyTorch module:
#   w_ll = [[ 0.5,  0.5], [ 0.5,  0.5]]
#   w_lh = [[ 0.5,  0.5], [-0.5, -0.5]]
#   w_hl = [[ 0.5, -0.5], [ 0.5, -0.5]]
#   w_hh = [[ 0.5, -0.5], [-0.5,  0.5]]
# conv_transpose2d(stride=2, k=2) places x[i,j]*w[ki,kj] at output
# (2i+ki, 2j+kj), so each of the 4 output phases is a +/-0.5 linear
# combination of the 4 subbands.


def _idwt_kernel(x_ref, o_ref):
    # x_ref / o_ref: (T, 4, TH, W).
    # Input dim-1 = subband (LL, LH, HL, HH); output dim-1 = phase ki*2 + kj.
    ll = x_ref[:, 0, :, :].astype(jnp.float32)
    lh = x_ref[:, 1, :, :].astype(jnp.float32)
    hl = x_ref[:, 2, :, :].astype(jnp.float32)
    hh = x_ref[:, 3, :, :].astype(jnp.float32)

    # Butterfly: 8 adds + 4 muls instead of 12 adds + 4 muls.
    a = ll + lh
    b = ll - lh
    c = hl + hh
    d = hl - hh

    dt = o_ref.dtype
    o_ref[:, 0, :, :] = (0.5 * (a + c)).astype(dt)  # (ki=0, kj=0)
    o_ref[:, 1, :, :] = (0.5 * (a - c)).astype(dt)  # (ki=0, kj=1)
    o_ref[:, 2, :, :] = (0.5 * (b + d)).astype(dt)  # (ki=1, kj=0)
    o_ref[:, 3, :, :] = (0.5 * (b - d)).astype(dt)  # (ki=1, kj=1)


# ----------------------- static tile-size selection ------------------------

def _pad8(v):
    return -(-v // 8) * 8


def _pad128(v):
    return -(-v // 128) * 128


def _block_bytes(t, th, w, itemsize):
    """VMEM footprint of one (t, 4, th, w) block after (8, 128) padding."""
    return t * 4 * _pad8(th) * _pad128(w) * itemsize


def _largest_divisor_leq(n, cap):
    cap = max(1, min(n, cap))
    for d in range(cap, 0, -1):
        if n % d == 0:
            return d
    return 1


def _choose_tiles(nc, h, w, itemsize, target_bytes,
                  min_steps=8, min_block=256 << 10):
    # TH candidates: multiples of 8 that divide H, plus full H (always legal).
    th_cands = sorted({d for d in range(8, h + 1, 8) if h % d == 0} | {h},
                      reverse=True)
    fitting = [d for d in th_cands
               if _block_bytes(1, d, w, itemsize) <= target_bytes]
    th = fitting[0] if fitting else th_cands[-1]

    per_chan = _block_bytes(1, th, w, itemsize)
    t = _largest_divisor_leq(nc, max(1, target_bytes // max(1, per_chan)))

    # Keep enough grid steps for both v7x TensorCores and the DMA pipeline,
    # but never shrink blocks below min_block (overhead would dominate).
    while ((nc // t) * (h // th) < min_steps
           and _block_bytes(t, th, w, itemsize) > min_block):
        if t > 1:
            t = _largest_divisor_leq(nc, t - 1)
        else:
            smaller = [d for d in th_cands if d < th]
            if not smaller:
                break
            th = smaller[0]
    return t, th


# --------------------------------- wrapper ----------------------------------

def dwt_inverse(x, *, block_bytes_target=2 << 20):
    """x: (N, 4*C, H, W) NCHW -> y: (N, C, 2H, 2W); matches DWTInverse.forward."""
    n, c4, h, w = x.shape
    assert c4 % 4 == 0, "channel dimension must be a multiple of 4"
    c = c4 // 4
    nc = n * c
    itemsize = np.dtype(x.dtype).itemsize

    # Free reshape (minor-dim layout unchanged): channels -> (nc, subband).
    xr = x.reshape(nc, 4, h, w)

    t, th = _choose_tiles(nc, h, w, itemsize, block_bytes_target)
    grid = (nc // t, h // th)

    block_bytes = _block_bytes(t, th, w, itemsize)
    # Input + output blocks, each double-buffered, plus headroom.  Capped so it
    # remains valid on v7x (64 MiB physical VMEM) as well as v5e/v6e.
    vmem_limit = int(min(max(4 * block_bytes + (8 << 20), 16 << 20), 48 << 20))

    phases = pl.pallas_call(
        _idwt_kernel,
        out_shape=jax.ShapeDtypeStruct((nc, 4, h, w), x.dtype),
        grid=grid,
        in_specs=[pl.BlockSpec((t, 4, th, w), lambda i, j: (i, 0, j, 0))],
        out_specs=pl.BlockSpec((t, 4, th, w), lambda i, j: (i, 0, j, 0)),
        compiler_params=pltpu.CompilerParams(
            dimension_semantics=("parallel", "parallel"),
            vmem_limit_bytes=vmem_limit,
        ),
    )(xr)

    # Glue: 2x2 pixel-shuffle of the phases onto the (2H, 2W) spatial grid.
    # TODO(synk): fuse this interleave into the kernel (needs an in-kernel
    # lane interleave whose Mosaic lowering is not guaranteed).
    y = phases.reshape(n, c, 2, 2, h, w)        # (N, C, ki, kj, H, W)
    y = jnp.transpose(y, (0, 1, 4, 2, 5, 3))    # (N, C, H, ki, W, kj)
    return y.reshape(n, c, 2 * h, 2 * w)


# ------------------------------- reference ----------------------------------

def _reference_idwt(x):
    """Pure-JAX reference of conv_transpose2d with the fixed Haar filters."""
    n, c4, h, w = x.shape
    c = c4 // 4
    xr = x.reshape(n, c, 4, h, w).astype(jnp.float32)
    ll, lh, hl, hh = xr[:, :, 0], xr[:, :, 1], xr[:, :, 2], xr[:, :, 3]
    y00 = 0.5 * (ll + lh + hl + hh)
    y01 = 0.5 * (ll + lh - hl - hh)
    y10 = 0.5 * (ll - lh + hl - hh)
    y11 = 0.5 * (ll - lh - hl + hh)
    row0 = jnp.stack([y00, y01], axis=-1)       # (N, C, H, W, 2)
    row1 = jnp.stack([y10, y11], axis=-1)
    y = jnp.stack([row0, row1], axis=-3)        # (N, C, H, 2, W, 2)
    return y.reshape(n, c, 2 * h, 2 * w).astype(x.dtype)


if __name__ == "__main__":
    key = jax.random.PRNGKey(0)
    # batch=2, channels=4 (-> C=1 output channel), spatial=16
    x = jax.random.normal(key, (2, 4, 16, 16), dtype=jnp.float32)

    fwd = jax.jit(dwt_inverse)
    y = jax.block_until_ready(fwd(x))

    y_ref = _reference_idwt(x)
    assert y.shape == (2, 1, 32, 32), y.shape
    assert jnp.allclose(y, y_ref, atol=1e-5), "mismatch vs pure-JAX reference"

    print("KERNEL_OK")
</pallas_src>

<mosaic_0001>
module attributes {stable_mosaic.version = 11 : i64} {
  func.func @_idwt_kernel(%arg0: i32, %arg1: i32, %arg2: memref<2x4x16x16xf32, #tpu.memory_space<vmem>>, %arg3: memref<2x4x16x16xf32, #tpu.memory_space<vmem>>) attributes {dimension_semantics = [#tpu.dimension_semantics<parallel>, #tpu.dimension_semantics<parallel>], iteration_bounds = array<i64: 1, 1>, scalar_prefetch = 0 : i64, scratch_operands = 0 : i64, tpu.core_type = #tpu.core_type<tc>, window_params = [{transform_indices = @transform_0, window_bounds = array<i64: 2, 4, 16, 16>}, {transform_indices = @transform_1, window_bounds = array<i64: 2, 4, 16, 16>}]} {
    %c0 = arith.constant 0 : index
    %c0_0 = arith.constant 0 : index
    %c0_1 = arith.constant 0 : index
    %c0_2 = arith.constant 0 : index
    %0 = vector.load %arg2[%c0, %c0_0, %c0_1, %c0_2] : memref<2x4x16x16xf32, #tpu.memory_space<vmem>>, vector<2x1x16x16xf32>
    %1 = vector.shape_cast %0 : vector<2x1x16x16xf32> to vector<2x16x16xf32>
    %c0_3 = arith.constant 0 : index
    %c1 = arith.constant 1 : index
    %c0_4 = arith.constant 0 : index
    %c0_5 = arith.constant 0 : index
    %2 = vector.load %arg2[%c0_3, %c1, %c0_4, %c0_5] : memref<2x4x16x16xf32, #tpu.memory_space<vmem>>, vector<2x1x16x16xf32>
    %3 = vector.shape_cast %2 : vector<2x1x16x16xf32> to vector<2x16x16xf32>
    %c0_6 = arith.constant 0 : index
    %c2 = arith.constant 2 : index
    %c0_7 = arith.constant 0 : index
    %c0_8 = arith.constant 0 : index
    %4 = vector.load %arg2[%c0_6, %c2, %c0_7, %c0_8] : memref<2x4x16x16xf32, #tpu.memory_space<vmem>>, vector<2x1x16x16xf32>
    %5 = vector.shape_cast %4 : vector<2x1x16x16xf32> to vector<2x16x16xf32>
    %c0_9 = arith.constant 0 : index
    %c3 = arith.constant 3 : index
    %c0_10 = arith.constant 0 : index
    %c0_11 = arith.constant 0 : index
    %6 = vector.load %arg2[%c0_9, %c3, %c0_10, %c0_11] : memref<2x4x16x16xf32, #tpu.memory_space<vmem>>, vector<2x1x16x16xf32>
    %7 = vector.shape_cast %6 : vector<2x1x16x16xf32> to vector<2x16x16xf32>
    %8 = arith.addf %1, %3 : vector<2x16x16xf32>
    %9 = arith.subf %1, %3 : vector<2x16x16xf32>
    %10 = arith.addf %5, %7 : vector<2x16x16xf32>
    %11 = arith.subf %5, %7 : vector<2x16x16xf32>
    %12 = arith.addf %8, %10 : vector<2x16x16xf32>
    %cst = arith.constant 5.000000e-01 : f32
    %13 = vector.broadcast %cst : f32 to vector<2x16x16xf32>
    %14 = arith.mulf %13, %12 : vector<2x16x16xf32>
    %c0_12 = arith.constant 0 : index
    %c0_13 = arith.constant 0 : index
    %c0_14 = arith.constant 0 : index
    %c0_15 = arith.constant 0 : index
    %15 = vector.load %arg3[%c0_12, %c0_13, %c0_14, %c0_15] : memref<2x4x16x16xf32, #tpu.memory_space<vmem>>, vector<2x1x16x16xf32>
    %16 = vector.shape_cast %15 : vector<2x1x16x16xf32> to vector<2x16x16xf32>
    %17 = vector.shape_cast %14 : vector<2x16x16xf32> to vector<2x1x16x16xf32>
    tpu.vector_store %arg3[%c0_12, %c0_13, %c0_14, %c0_15], %17 {strides = array<i32>} : memref<2x4x16x16xf32, #tpu.memory_space<vmem>>, vector<2x1x16x16xf32>,
    %18 = arith.subf %8, %10 : vector<2x16x16xf32>
    %cst_16 = arith.constant 5.000000e-01 : f32
    %19 = vector.broadcast %cst_16 : f32 to vector<2x16x16xf32>
    %20 = arith.mulf %19, %18 : vector<2x16x16xf32>
    %c0_17 = arith.constant 0 : index
    %c1_18 = arith.constant 1 : index
    %c0_19 = arith.constant 0 : index
    %c0_20 = arith.constant 0 : index
    %21 = vector.load %arg3[%c0_17, %c1_18, %c0_19, %c0_20] : memref<2x4x16x16xf32, #tpu.memory_space<vmem>>, vector<2x1x16x16xf32>
    %22 = vector.shape_cast %21 : vector<2x1x16x16xf32> to vector<2x16x16xf32>
    %23 = vector.shape_cast %20 : vector<2x16x16xf32> to vector<2x1x16x16xf32>
    tpu.vector_store %arg3[%c0_17, %c1_18, %c0_19, %c0_20], %23 {strides = array<i32>} : memref<2x4x16x16xf32, #tpu.memory_space<vmem>>, vector<2x1x16x16xf32>,
    %24 = arith.addf %9, %11 : vector<2x16x16xf32>
    %cst_21 = arith.constant 5.000000e-01 : f32
    %25 = vector.broadcast %cst_21 : f32 to vector<2x16x16xf32>
    %26 = arith.mulf %25, %24 : vector<2x16x16xf32>
    %c0_22 = arith.constant 0 : index
    %c2_23 = arith.constant 2 : index
    %c0_24 = arith.constant 0 : index
    %c0_25 = arith.constant 0 : index
    %27 = vector.load %arg3[%c0_22, %c2_23, %c0_24, %c0_25] : memref<2x4x16x16xf32, #tpu.memory_space<vmem>>, vector<2x1x16x16xf32>
    %28 = vector.shape_cast %27 : vector<2x1x16x16xf32> to vector<2x16x16xf32>
    %29 = vector.shape_cast %26 : vector<2x16x16xf32> to vector<2x1x16x16xf32>
    tpu.vector_store %arg3[%c0_22, %c2_23, %c0_24, %c0_25], %29 {strides = array<i32>} : memref<2x4x16x16xf32, #tpu.memory_space<vmem>>, vector<2x1x16x16xf32>,
    %30 = arith.subf %9, %11 : vector<2x16x16xf32>
    %cst_26 = arith.constant 5.000000e-01 : f32
    %31 = vector.broadcast %cst_26 : f32 to vector<2x16x16xf32>
    %32 = arith.mulf %31, %30 : vector<2x16x16xf32>
    %c0_27 = arith.constant 0 : index
    %c3_28 = arith.constant 3 : index
    %c0_29 = arith.constant 0 : index
    %c0_30 = arith.constant 0 : index
    %33 = vector.load %arg3[%c0_27, %c3_28, %c0_29, %c0_30] : memref<2x4x16x16xf32, #tpu.memory_space<vmem>>, vector<2x1x16x16xf32>
    %34 = vector.shape_cast %33 : vector<2x1x16x16xf32> to vector<2x16x16xf32>
    %35 = vector.shape_cast %32 : vector<2x16x16xf32> to vector<2x1x16x16xf32>
    tpu.vector_store %arg3[%c0_27, %c3_28, %c0_29, %c0_30], %35 {strides = array<i32>} : memref<2x4x16x16xf32, #tpu.memory_space<vmem>>, vector<2x1x16x16xf32>,
    return
  }
  func.func @transform_0(%arg0: i32, %arg1: i32) -> (i32, i32, i32, i32) {
    %c0_i32 = arith.constant 0 : i32
    %c0_i32_0 = arith.constant 0 : i32
    %c0_i32_1 = arith.constant 0 : i32
    return %arg0, %c0_i32, %arg1, %c0_i32_0 : i32, i32, i32, i32
  }
  func.func @transform_1(%arg0: i32, %arg1: i32) -> (i32, i32, i32, i32) {
    %c0_i32 = arith.constant 0 : i32
    %c0_i32_0 = arith.constant 0 : i32
    %c0_i32_1 = arith.constant 0 : i32
    return %arg0, %c0_i32, %arg1, %c0_i32_0 : i32, i32, i32, i32
  }
}

</mosaic_0001>

<bundles_post_ra>
// kernel: dwt_inverse.1
= control target key start
LH: loop header
LB: loop body
LE: loop exit
PB: predicated region body
PF: predicated region fallthrough
CT: control target
= control target key end

     0   :  { %6 = vsyncpa [#allocation3], 0  ;;  %s153_s6 = smov [#allocation2]   ;;  %s246_s0 = inlined_call_operand.hbm [shape: f32[2,4,16,16], index: 0, kind: input, shape index: {}]   ;;  %s247_s1 = inlined_call_operand.vmem [shape: f32[2,4,16,16], index: 1, kind: output, shape index: {}]  }
   0x1   :  { %s12_s7 = sshll.u32 %s153_s6, 4  ;;  %s129_s10 = scalar_lea.hbm %s246_s0, 2048  ;;  %s13_s7 = int_to_ptr.vmem [resolvable:$true] %s12_s7 }
   0x2   :  { %p130_p0 = scmp.ne.s32.totalorder %s246_s0, %s129_s10  ;;  %p133_p1 = scmp.lt.u32.totalorder %s129_s10, %s246_s0 }
   0x4   :  { %p135_p2 = pnand %p133_p1, %p130_p0 }
   0x6   :  { %138 = shalt.err (!%p135_p2)
}
   0x7   :  { %s139_s15 = scalar_lea.vmem %s13_s7, 2048  ;;  %p144_p4 = scmp.lt.s32.totalorder %s13_s7, %s13_s7 }
   0x8   :  { %p140_p3 = scmp.ne.s32.totalorder %s13_s7, %s139_s15  ;;  %p145_p5 = scmp.lt.s32.totalorder %s139_s15, %s139_s15 }
   0xa   :  { %p146_p6 = por %p145_p5, %p144_p4 }
   0xc   :  { %p147_p7 = pnand %p146_p6, %p140_p3 }
   0xe   :  { %150 = shalt.err (!%p147_p7)
}
   0xf   :  { %s154_s16 = smov 128   ;;  %s155_s17 = smov 8  }
  0x10   :  { %18 = dma.hbm_to_vmem [thread:$0]  %s246_s0, 2048, %s13_s7, [#allocation3], %s154_s16, %s154_s16, %s155_s17  }
  0x11   :  { %151 = dma.done.wait [#allocation3], 2048  }
  0x12   :  { %152 = vsyncadd [#allocation3], 4294965248  ;;  %v22_v0 = vld [vmem:[#allocation2] sm:$0xff]  ;;  %v27_v1 = vld [vmem:[#allocation2 + $0x10] sm:$0xff]  ;;  %vm65_vm0 = vcmask 130048  }
  0x13   :  { %v32_v2 = vld [vmem:[#allocation2 + $0x20] sm:$0xff]  ;;  %v37_v3 = vld [vmem:[#allocation2 + $0x30] sm:$0xff]  ;;  %v41_v4 = vadd.f32 %v27_v1, %v22_v0  ;;  %v23_v5 = vld [vmem:[#allocation2 + $0x8] sm:$0xff]  ;;  %v178_v7 = vsub.f32 %v22_v0, %v27_v1 }
  0x14   :  { %v28_v6 = vld [vmem:[#allocation2 + $0x18] sm:$0xff]  ;;  %v49_v8 = vadd.f32 %v37_v3, %v32_v2  ;;  %v33_v9 = vld [vmem:[#allocation2 + $0x28] sm:$0xff]  ;;  %v24_v12 = vld [vmem:[#allocation2 + $0x40] sm:$0xff]  ;;  %v53_v13 = vsub.f32 %v32_v2, %v37_v3 }
  0x15   :  { %v38_v10 = vld [vmem:[#allocation2 + $0x38] sm:$0xff]  ;;  %v42_v11 = vadd.f32 %v28_v6, %v23_v5  ;;  %v29_v15 = vld [vmem:[#allocation2 + $0x50] sm:$0xff]  ;;  %v34_v16 = vld [vmem:[#allocation2 + $0x60] sm:$0xff]  ;;  %v46_v18 = vsub.f32 %v23_v5, %v28_v6 }
  0x16   :  { %v50_v14 = vadd.f32 %v38_v10, %v33_v9  ;;  %v39_v17 = vld [vmem:[#allocation2 + $0x70] sm:$0xff]  ;;  %v54_v19 = vsub.f32 %v33_v9, %v38_v10  ;;  %v57_v20 = vadd.f32 %v49_v8, %v41_v4  ;;  %v43_v21 = vadd.f32 %v29_v15, %v24_v12  ;;  %v25_v23 = vld [vmem:[#allocation2 + $0x48] sm:$0xff]  ;;  %v30_v24 = vld [vmem:[#allocation2 + $0x58] sm:$0xff] }
  0x17   :  { %v51_v22 = vadd.f32 %v39_v17, %v34_v16  ;;  %v35_v25 = vld [vmem:[#allocation2 + $0x68] sm:$0xff]  ;;  %v70_v26 = vsub.f32 %v41_v4, %v49_v8  ;;  %v40_v28 = vld [vmem:[#allocation2 + $0x78] sm:$0xff]  ;;  %v44_v29 = vadd.f32 %v30_v24, %v25_v23  ;;  %v83_v31 = vadd.f32 %v53_v13, %v178_v7 }
  0x18   :  { %v58_v27 = vadd.f32 %v50_v14, %v42_v11  ;;  %v71_v30 = vsub.f32 %v42_v11, %v50_v14  ;;  %v61_v32 = vmul.f32 0.5, %v57_v20  ;;  %v52_v34 = vadd.f32 %v40_v28, %v35_v25 }
  0x19   :  { %v59_v33 = vadd.f32 %v51_v22, %v43_v21  ;;  %v74_v35 = vmul.f32 0.5, %v70_v26  ;;  %v72_v38 = vsub.f32 %v43_v21, %v51_v22  ;;  %v87_v39 = vmul.f32 0.5, %v83_v31 }
  0x1a   :  { %v62_v36 = vmul.f32 0.5, %v58_v27  ;;  %v75_v37 = vmul.f32 0.5, %v71_v30  ;;  %66 = vst.msk [vmem:[%s247_s1] sm:$0xff] %vm65_vm0, %v61_v32  ;;  %v60_v41 = vadd.f32 %v52_v34, %v44_v29  ;;  %v73_v42 = vsub.f32 %v44_v29, %v52_v34 }
  0x1b   :  { %v63_v40 = vmul.f32 0.5, %v59_v33  ;;  %114 = vst.msk [vmem:[%s247_s1 + $0x10] sm:$0xff] %vm65_vm0, %v74_v35  ;;  %v84_v43 = vadd.f32 %v54_v19, %v46_v18  ;;  %v76_v44 = vmul.f32 0.5, %v72_v38  ;;  %118 = vst.msk [vmem:[%s247_s1 + $0x20] sm:$0xff] %vm65_vm0, %v87_v39  ;;  %v47_v45 = vsub.f32 %v24_v12, %v29_v15 }
  0x1c   :  { %67 = vst.msk [vmem:[%s247_s1 + $0x8] sm:$0xff] %vm65_vm0, %v62_v36  ;;  %115 = vst.msk [vmem:[%s247_s1 + $0x18] sm:$0xff] %vm65_vm0, %v75_v37  ;;  %v55_v46 = vsub.f32 %v34_v16, %v39_v17  ;;  %v48_v47 = vsub.f32 %v25_v23, %v30_v24  ;;  %v64_v48 = vmul.f32 0.5, %v60_v41  ;;  %v77_v49 = vmul.f32 0.5, %v73_v42 }
  0x1d   :  { %68 = vst.msk [vmem:[%s247_s1 + $0x40] sm:$0xff] %vm65_vm0, %v63_v40  ;;  %v88_v50 = vmul.f32 0.5, %v84_v43  ;;  %v56_v51 = vsub.f32 %v35_v25, %v40_v28  ;;  %116 = vst.msk [vmem:[%s247_s1 + $0x50] sm:$0xff] %vm65_vm0, %v76_v44  ;;  %v96_v53 = vsub.f32 %v178_v7, %v53_v13  ;;  %v97_v54 = vsub.f32 %v46_v18, %v54_v19 }
  0x1e   :  { %v85_v52 = vadd.f32 %v55_v46, %v47_v45  ;;  %v98_v55 = vsub.f32 %v47_v45, %v55_v46  ;;  %69 = vst.msk [vmem:[%s247_s1 + $0x48] sm:$0xff] %vm65_vm0, %v64_v48  ;;  %117 = vst.msk [vmem:[%s247_s1 + $0x58] sm:$0xff] %vm65_vm0, %v77_v49 }
  0x1f   :  { %119 = vst.msk [vmem:[%s247_s1 + $0x28] sm:$0xff] %vm65_vm0, %v88_v50  ;;  %v86_v56 = vadd.f32 %v56_v51, %v48_v47  ;;  %v99_v57 = vsub.f32 %v48_v47, %v56_v51  ;;  %v100_v59 = vmul.f32 0.5, %v96_v53  ;;  %v101_v60 = vmul.f32 0.5, %v97_v54 }
  0x20   :  { %v89_v58 = vmul.f32 0.5, %v85_v52  ;;  %v102_v61 = vmul.f32 0.5, %v98_v55 }
  0x21   :  { %v90_v62 = vmul.f32 0.5, %v86_v56  ;;  %v103_v63 = vmul.f32 0.5, %v99_v57  ;;  %122 = vst.msk [vmem:[%s247_s1 + $0x30] sm:$0xff] %vm65_vm0, %v100_v59  ;;  %123 = vst.msk [vmem:[%s247_s1 + $0x38] sm:$0xff] %vm65_vm0, %v101_v60 }
  0x22   :  { %120 = vst.msk [vmem:[%s247_s1 + $0x60] sm:$0xff] %vm65_vm0, %v89_v58  ;;  %124 = vst.msk [vmem:[%s247_s1 + $0x70] sm:$0xff] %vm65_vm0, %v102_v61 }
  0x23   :  { %121 = vst.msk [vmem:[%s247_s1 + $0x68] sm:$0xff] %vm65_vm0, %v90_v62  ;;  %125 = vst.msk [vmem:[%s247_s1 + $0x78] sm:$0xff] %vm65_vm0, %v103_v63 }
  0x24   :  { %113 = vsyncpa [#allocation3], 1 }

</bundles_post_ra>
